<compile_context>
chip_gen: v5e
topology: v5e:2x2
jax: 0.10.0
libtpu: 0.0.40
codegen_flags: <defaults>
</compile_context>

<pallas_src>
import functools

import jax
import jax.numpy as jnp
from jax.experimental import pallas as pl
from jax.experimental.pallas import tpu as pltpu


def _round_up(a: int, m: int) -> int:
    return -(-a // m) * m


def _listnet_kernel(x_ref, w1_ref, b1_ref, s2_ref, b2_ref, o_ref, *, sub_rows, out_cols):
    """One grid step: (block_rows, Fp) packed rows -> (block_rows, P) logits."""
    w1 = w1_ref[...]            # (Fp, Hp) bf16, block-diagonal copies of W1
    b1 = b1_ref[...]            # (1, Hp)  f32, tiled b1
    s2 = s2_ref[...]            # (Hp, 128) bf16, w2 folded into a segment-reduce matrix
    b2 = b2_ref[0]              # f32 scalar in SMEM
    n_sub = x_ref.shape[0] // sub_rows

    def body(s, carry):
        row0 = pl.multiple_of(s * sub_rows, sub_rows)
        xs = x_ref[pl.ds(row0, sub_rows), :].astype(jnp.bfloat16)       # (sr, Fp)
        h = jnp.dot(xs, w1, preferred_element_type=jnp.float32)         # MXU, f32 acc
        h = jnp.maximum(h + b1, 0.0)                                    # bias + ReLU (f32)
        # Second Linear: per-segment (32-lane) reduce against w2 done as a masked
        # (Hp, 128) MXU matmul; columns 0..P-1 hold the P packed logits of each row.
        logits = jnp.dot(h.astype(jnp.bfloat16), s2,
                         preferred_element_type=jnp.float32)            # (sr, 128)
        o_ref[pl.ds(row0, sub_rows), :] = (
            logits[:, :out_cols] + b2).astype(o_ref.dtype)
        return carry

    jax.lax.fori_loop(0, n_sub, body, 0)


def _fit_block(rows_needed: int, sub_rows: int):
    """Pick (block_rows, sub_rows) with block = n_sub * sub covering rows_needed tightly."""
    sub_rows = max(sub_rows, 8)
    n_sub = max(1, -(-rows_needed // sub_rows))
    sr = _round_up(-(-rows_needed // n_sub), 8)
    return sr * n_sub, sr


def listnet_forward(x, w1, b1, w2, b2, *, block_rows=8192, sub_rows=1024,
                    out_dtype=jnp.float32):
    """relu(x @ w1 + b1) @ w2 + b2 -> (N, 1).

    x: (N, F) float32 or bfloat16.  w1: (F, H).  b1: (H,) or (1, H).
    w2: (H,) or (H, 1).  b2: scalar-like.  block_rows/sub_rows are in *packed* rows.
    """
    N, F = x.shape
    H = w1.shape[1]
    f32 = jnp.float32

    # Lane packing: P logical rows per 128-lane row (P * F == 128 when F divides 128).
    P = 128 // F if (F <= 128 and 128 % F == 0) else 1
    Fp, Hp = P * F, P * H

    n_pad = _round_up(N, P)
    if n_pad != N:
        # Rare ragged case (N % P != 0): one extra pass over x.  Keep N a multiple of
        # P (= 128 // F) to stay on the zero-copy path.
        x = jnp.pad(x, ((0, n_pad - N), (0, 0)))
    np_rows = n_pad // P
    xp = x.reshape(np_rows, Fp)                 # free, row-major metadata-only reshape

    # Packed weights (tiny): block-diagonal W1, tiled b1, second layer folded into a
    # (Hp, 128) matrix whose first P columns carry w2 per 32-lane segment.
    w1p = jnp.kron(jnp.eye(P, dtype=f32), jnp.asarray(w1, f32)).astype(jnp.bfloat16)
    b1p = jnp.tile(jnp.asarray(b1, f32).reshape(1, H), (1, P))
    s2 = jnp.kron(jnp.eye(P, dtype=f32), jnp.asarray(w2, f32).reshape(H, 1))
    s2 = jnp.pad(s2, ((0, 0), (0, 128 - P))).astype(jnp.bfloat16)
    b2s = jnp.asarray(b2, f32).reshape((1,))

    # Row-tile sizing: as large as requested / needed, but keep >= 2 balanced grid steps
    # when there is enough work so both TensorCores are used on v7x, and never grossly
    # over-pad tiny inputs.
    br_req = min(block_rows, _round_up(np_rows, 8))
    if np_rows >= 4096 and br_req >= np_rows:
        br_req = -(-np_rows // 2)               # force >= 2 steps for megacore
    br, sr = _fit_block(br_req, sub_rows)
    steps = -(-np_rows // br)
    br, sr = _fit_block(-(-np_rows // steps), sr)   # balance the (ragged) last block
    steps = -(-np_rows // br)

    # Explicit VMEM budget: double-buffered x + lane-padded out blocks + weights + f32
    # sub-tile intermediates (v7x: 64 MiB physical / 32 MiB scoped default).
    lanes = max(Hp, 128)
    vmem_est = (2 * br * Fp * xp.dtype.itemsize        # x blocks (double-buffered)
                + 2 * br * 128 * 4                      # out blocks (lane-padded to 128)
                + 2 * ((Fp * Hp + Hp * 128) * 2 + 8 * lanes * 4)
                + 6 * sr * lanes * 4)                   # in-flight f32 sub-tiles
    vmem_limit = int(min(max(32 << 20, int(1.4 * vmem_est)), 48 << 20))

    cost = pl.CostEstimate(
        flops=2 * n_pad * F * H + 2 * n_pad * H,
        transcendentals=0,
        bytes_accessed=(np_rows * Fp * xp.dtype.itemsize + np_rows * P * 4
                        + (Fp * Hp + Hp * 128) * 2 + Hp * 4 + 4),
    )

    kernel = functools.partial(_listnet_kernel, sub_rows=sr, out_cols=P)
    out = pl.pallas_call(
        kernel,
        out_shape=jax.ShapeDtypeStruct((np_rows, P), out_dtype),
        grid_spec=pltpu.PrefetchScalarGridSpec(
            num_scalar_prefetch=0,
            grid=(steps,),
            in_specs=[
                pl.BlockSpec((br, Fp), lambda i: (i, 0)),              # packed x rows
                pl.BlockSpec((Fp, Hp), lambda i: (0, 0)),              # block-diag W1
                pl.BlockSpec((1, Hp), lambda i: (0, 0)),               # tiled b1
                pl.BlockSpec((Hp, 128), lambda i: (0, 0)),             # w2 segment matrix
                pl.BlockSpec(memory_space=pltpu.MemorySpace.SMEM),     # b2 scalar
            ],
            out_specs=pl.BlockSpec((br, P), lambda i: (i, 0)),         # packed logits
        ),
        compiler_params=pltpu.CompilerParams(
            dimension_semantics=("parallel",),       # shard row tiles across TCs (v7x)
            vmem_limit_bytes=vmem_limit,
        ),
        cost_estimate=cost,
    )(xp, w1p, b1p, s2, b2s)

    return out.reshape(n_pad)[:N].reshape(N, 1)


def init_listnet_params(key, num_input_features, hidden_dim, dtype=jnp.float32):
    """Deterministic init mirroring torch.nn.Linear default U(-1/sqrt(fan_in), 1/sqrt(fan_in))."""
    k1, k2, k3, k4 = jax.random.split(key, 4)
    bound1 = 1.0 / (num_input_features ** 0.5)
    bound2 = 1.0 / (hidden_dim ** 0.5)
    w1 = jax.random.uniform(k1, (num_input_features, hidden_dim), dtype, -bound1, bound1)
    b1 = jax.random.uniform(k2, (1, hidden_dim), dtype, -bound1, bound1)
    w2 = jax.random.uniform(k3, (hidden_dim, 1), dtype, -bound2, bound2)
    b2 = jax.random.uniform(k4, (1, 1), dtype, -bound2, bound2)
    return w1, b1, w2, b2


def _reference_quantized(x, w1, b1, w2, b2):
    """Pure-JAX reference that mirrors the kernel's bf16 rounding steps exactly."""
    hi = jax.lax.Precision.HIGHEST
    xq = x.astype(jnp.bfloat16).astype(jnp.float32)
    w1q = w1.astype(jnp.bfloat16).astype(jnp.float32)
    w2q = w2.astype(jnp.bfloat16).astype(jnp.float32)
    h = jnp.maximum(jnp.dot(xq, w1q, precision=hi) + b1.reshape(1, -1), 0.0)
    hq = h.astype(jnp.bfloat16).astype(jnp.float32)
    return jnp.dot(hq, w2q.reshape(-1, 1), precision=hi) + jnp.asarray(b2, jnp.float32).reshape(1, 1)


if __name__ == "__main__":
    key = jax.random.PRNGKey(0)
    k_x, k_x2, k_p = jax.random.split(key, 3)

    num_input_features = 32
    hidden_dim = 32
    w1, b1, w2, b2 = init_listnet_params(k_p, num_input_features, hidden_dim)

    # Case 1: f32 input (module-faithful), single grid step, 4 rows packed per 128 lanes.
    n_docs = 1000
    x = jax.random.normal(k_x, (n_docs, num_input_features), dtype=jnp.float32)
    logits = jax.block_until_ready(listnet_forward(x, w1, b1, w2, b2))
    assert logits.shape == (n_docs, 1)
    ref_q = _reference_quantized(x, w1, b1, w2, b2)
    assert jnp.allclose(logits, ref_q, atol=3e-4, rtol=3e-4)

    # Same math via the caller-side bf16 fast path (halved HBM traffic, no extra pass).
    logits_bf16 = jax.block_until_ready(listnet_forward(x.astype(jnp.bfloat16), w1, b1, w2, b2))
    assert jnp.allclose(logits_bf16, ref_q, atol=3e-4, rtol=3e-4)

    # Loose check against the full-f32 module semantics (only bf16 rounding differs).
    hi = jax.lax.Precision.HIGHEST
    h32 = jnp.maximum(jnp.dot(x, w1, precision=hi) + b1, 0.0)
    ref32 = jnp.dot(h32, w2, precision=hi) + b2
    assert jnp.allclose(logits, ref32, atol=5e-2, rtol=5e-2)

    # Case 2: multi-step grid + ragged (no-pad) last block + inner sub-tile loop.
    n_docs2 = 4100
    x2 = jax.random.normal(k_x2, (n_docs2, num_input_features), dtype=jnp.float32)
    logits2 = jax.block_until_ready(
        listnet_forward(x2, w1, b1, w2, b2, block_rows=512, sub_rows=128))
    assert logits2.shape == (n_docs2, 1)
    ref2 = _reference_quantized(x2, w1, b1, w2, b2)
    assert jnp.allclose(logits2, ref2, atol=3e-4, rtol=3e-4)

    print("KERNEL_OK")
</pallas_src>

<mosaic_0001>
module attributes {stable_mosaic.version = 11 : i64} {
  func.func @_listnet_kernel(%arg0: i32, %arg1: memref<256x128xf32, #tpu.memory_space<vmem>>, %arg2: memref<128x128xbf16, #tpu.memory_space<vmem>>, %arg3: memref<1x128xf32, #tpu.memory_space<vmem>>, %arg4: memref<128x128xbf16, #tpu.memory_space<vmem>>, %arg5: memref<1xf32, #tpu.memory_space<smem>>, %arg6: memref<256x4xf32, #tpu.memory_space<vmem>>) attributes {dimension_semantics = [#tpu.dimension_semantics<parallel>], iteration_bounds = array<i64: 1>, scalar_prefetch = 0 : i64, scratch_operands = 0 : i64, tpu.core_type = #tpu.core_type<tc>, window_params = [{transform_indices = @transform_0, window_bounds = array<i64: 256, 128>}, {pipeline_mode = #tpu.pipeline_mode<synchronous>, transform_indices = @transform_1, window_bounds = array<i64: 128, 128>}, {pipeline_mode = #tpu.pipeline_mode<synchronous>, transform_indices = @transform_2, window_bounds = array<i64: 1, 128>}, {pipeline_mode = #tpu.pipeline_mode<synchronous>, transform_indices = @transform_3, window_bounds = array<i64: 128, 128>}, {transform_indices = @transform_4, window_bounds = array<i64: 1>}, {transform_indices = @transform_5, window_bounds = array<i64: 256, 4>}]} {
    %c0 = arith.constant 0 : index
    %c0_0 = arith.constant 0 : index
    %0 = vector.load %arg2[%c0, %c0_0] : memref<128x128xbf16, #tpu.memory_space<vmem>>, vector<128x128xbf16>
    %c0_1 = arith.constant 0 : index
    %c0_2 = arith.constant 0 : index
    %1 = vector.load %arg3[%c0_1, %c0_2] : memref<1x128xf32, #tpu.memory_space<vmem>>, vector<1x128xf32>
    %c0_3 = arith.constant 0 : index
    %c0_4 = arith.constant 0 : index
    %2 = vector.load %arg4[%c0_3, %c0_4] : memref<128x128xbf16, #tpu.memory_space<vmem>>, vector<128x128xbf16>
    %c0_5 = arith.constant 0 : index
    %3 = memref.load %arg5[%c0_5] : memref<1xf32, #tpu.memory_space<smem>>
    %c0_i32 = arith.constant 0 : i32
    %c256_i32 = arith.constant 256 : i32
    %4 = arith.muli %c0_i32, %c256_i32 : i32
    %5 = tpu.assume_multiple %4, 256 : i32
    %6 = arith.index_cast %5 : i32 to index
    %c0_6 = arith.constant 0 : index
    %7 = vector.load %arg1[%6, %c0_6] : memref<256x128xf32, #tpu.memory_space<vmem>>, vector<256x128xf32>
    %8 = arith.truncf %7 : vector<256x128xf32> to vector<256x128xbf16>
    %cst = arith.constant dense<0.000000e+00> : vector<256x128xf32>
    %9 = tpu.matmul %8, %0, %cst {dimension_numbers = #tpu.dot_dimension_numbers<[1], [0], [0], [1], [0, 0, 1, 1], [], []>} : vector<256x128xbf16>, vector<128x128xbf16>, vector<256x128xf32> -> vector<256x128xf32>
    %10 = vector.broadcast %1 : vector<1x128xf32> to vector<256x128xf32>
    %11 = arith.addf %9, %10 : vector<256x128xf32>
    %cst_7 = arith.constant 0.000000e+00 : f32
    %12 = vector.broadcast %cst_7 : f32 to vector<256x128xf32>
    %13 = arith.maximumf %11, %12 : vector<256x128xf32>
    %14 = arith.truncf %13 : vector<256x128xf32> to vector<256x128xbf16>
    %cst_8 = arith.constant dense<0.000000e+00> : vector<256x128xf32>
    %15 = tpu.matmul %14, %2, %cst_8 {dimension_numbers = #tpu.dot_dimension_numbers<[1], [0], [0], [1], [0, 0, 1, 1], [], []>} : vector<256x128xbf16>, vector<128x128xbf16>, vector<256x128xf32> -> vector<256x128xf32>
    %16 = vector.extract_strided_slice %15 {offsets = [0, 0], sizes = [256, 4], strides = [1, 1]} : vector<256x128xf32> to vector<256x4xf32>
    %17 = vector.broadcast %3 : f32 to vector<256x4xf32>
    %18 = arith.addf %16, %17 : vector<256x4xf32>
    %19 = arith.index_cast %5 : i32 to index
    %c0_9 = arith.constant 0 : index
    %20 = vector.load %arg6[%19, %c0_9] : memref<256x4xf32, #tpu.memory_space<vmem>>, vector<256x4xf32>
    tpu.vector_store %arg6[%19, %c0_9], %18 {strides = array<i32>} : memref<256x4xf32, #tpu.memory_space<vmem>>, vector<256x4xf32>,
    %c1_i32 = arith.constant 1 : i32
    return
  }
  func.func @transform_0(%arg0: i32) -> (i32, i32) {
    %c0_i32 = arith.constant 0 : i32
    %c0_i32_0 = arith.constant 0 : i32
    return %arg0, %c0_i32 : i32, i32
  }
  func.func @transform_1(%arg0: i32) -> (i32, i32) {
    %c0_i32 = arith.constant 0 : i32
    %c0_i32_0 = arith.constant 0 : i32
    %c0_i32_1 = arith.constant 0 : i32
    return %c0_i32, %c0_i32_0 : i32, i32
  }
  func.func @transform_2(%arg0: i32) -> (i32, i32) {
    %c0_i32 = arith.constant 0 : i32
    %c0_i32_0 = arith.constant 0 : i32
    %c0_i32_1 = arith.constant 0 : i32
    return %c0_i32, %c0_i32_0 : i32, i32
  }
  func.func @transform_3(%arg0: i32) -> (i32, i32) {
    %c0_i32 = arith.constant 0 : i32
    %c0_i32_0 = arith.constant 0 : i32
    %c0_i32_1 = arith.constant 0 : i32
    return %c0_i32, %c0_i32_0 : i32, i32
  }
  func.func @transform_4(%arg0: i32) -> i32 {
    %c0_i32 = arith.constant 0 : i32
    %c0_i32_0 = arith.constant 0 : i32
    return %c0_i32 : i32
  }
  func.func @transform_5(%arg0: i32) -> (i32, i32) {
    %c0_i32 = arith.constant 0 : i32
    %c0_i32_0 = arith.constant 0 : i32
    return %arg0, %c0_i32 : i32, i32
  }
}

</mosaic_0001>

<bundles_post_ra>
// kernel: tpu_custom_call.1
= control target key start
LH: loop header
LB: loop body
LE: loop exit
PB: predicated region body
PF: predicated region fallthrough
CT: control target
= control target key end

     0   :  { %11 = vsyncpa [#allocation4], 0  ;;  %s975_s0 = inlined_call_operand.hbm [shape: f32[250,128], index: 0, kind: input, shape index: {}]   ;;  %s976_s1 = inlined_call_operand.hbm [shape: bf16[128,128], index: 1, kind: input, shape index: {}]   ;;  %s977_s2 = inlined_call_operand.vmem [shape: f32[1,128], index: 2, kind: input, shape index: {}]   ;;  %s978_s3 = inlined_call_operand.hbm [shape: bf16[128,128], index: 3, kind: input, shape index: {}]   ;;  %s979_s4 = inlined_call_operand.<no memory space> [shape: f32[1], index: 4, kind: input, shape index: {}]   ;;  %s980_s5 = inlined_call_operand.vmem [shape: f32[250,4], index: 5, kind: output, shape index: {}]  }
   0x1   :  { %12 = vsyncpa [#allocation6], 0  ;;  %s30_s20 = sshll.u32 %s976_s1, 4  ;;  %s727_s21 = smov [#allocation5]   ;;  %s31_s20 = int_to_ptr.hbm [resolvable:$true] %s30_s20 }
   0x2   :  { %s32_s22 = sshll.u32 %s727_s21, 4  ;;  %s17_s25 = sshll.u32 %s975_s0, 4  ;;  %s33_s22 = int_to_ptr.vmem [resolvable:$true] %s32_s22  ;;  %s18_s25 = int_to_ptr.hbm [resolvable:$true] %s17_s25 }
   0x3   :  { %s728_s26 = smov 64   ;;  %s729_s27 = smov 4  }
   0x4   :  { %38 = dma.hbm_to_vmem [thread:$0]  %s31_s20, 1024, %s33_s22, [#allocation6], %s728_s26, %s728_s26, %s729_s27  }
   0x5   :  { %s730_s28 = smov [#allocation3]   ;;  %s731_s30 = smov 128  }
   0x6   :  { %s19_s29 = sshll.u32 %s730_s28, 4  ;;  %s732_s6 = smov 8   ;;  %s20_s29 = int_to_ptr.vmem [resolvable:$true] %s19_s29 }
   0x7   :  { %25 = dma.hbm_to_vmem [thread:$0]  %s18_s25, 4096, %s20_s29, [#allocation4], %s731_s30, %s731_s30, %s732_s6  }
   0x8   :  { %s45_s8 = sshll.u32 %s978_s3, 4  ;;  %s733_s9 = smov [#allocation7]   ;;  %s46_s8 = int_to_ptr.hbm [resolvable:$true] %s45_s8 }
   0x9   :  { %s47_s10 = sshll.u32 %s733_s9, 4  ;;  %s48_s10 = int_to_ptr.vmem [resolvable:$true] %s47_s10 }
   0xa   :  { %53 = dma.hbm_to_vmem [thread:$0]  %s46_s8, 1024, %s48_s10, [#allocation6], %s728_s26, %s728_s26, %s729_s27  }
   0xb   :  { %723 = dma.done.wait [#allocation4], 4096  }
   0xc   :  { %724 = vsyncadd [#allocation4], 4294963200 }
   0xd   :  { %725 = dma.done.wait [#allocation6], 2048  }
   0xe   :  { %726 = vsyncadd [#allocation6], 4294965248  ;;  %v618_v0 = vld [vmem:[#allocation5 + $0x38] sm:$0xff]  ;;  %v617_v1 = vld [vmem:[#allocation5 + $0x30] sm:$0xff]  ;;  %vm508_vm0 = vcmask 31744  }
   0xf   :  { %201 = vmatpush.bf16.msra.mxu0 %v618_v0  ;;  %627 = vmatpush.bf16.msra.mxu2 %v618_v0  ;;  %v616_v2 = vld [vmem:[#allocation5 + $0x28] sm:$0xff]  ;;  %v615_v3 = vld [vmem:[#allocation5 + $0x20] sm:$0xff]  ;;  %v614_v4 = vld [vmem:[#allocation5 + $0x18] sm:$0xff] }
  0x10   :  { %v613_v5 = vld [vmem:[#allocation5 + $0x10] sm:$0xff]  ;;  %v612_v6 = vld [vmem:[#allocation5 + $0x8] sm:$0xff]  ;;  %v611_v7 = vld [vmem:[#allocation5] sm:$0xff] }
  0x11   :  { %v102_v8 = vld [vmem:[#allocation3] sm:$0xff]  ;;  %v103_v9 = vld [vmem:[#allocation3 + $0x8] sm:$0xff]  ;;  %v104_v14 = vld [vmem:[#allocation3 + $0x10] sm:$0xff] }
  0x12   :  { %v118_v10 = vld [vmem:[#allocation3 + $0x80] sm:$0xff]  ;;  %v119_v11 = vld [vmem:[#allocation3 + $0x88] sm:$0xff]  ;;  %v134_v12 = vpack.c.bf16 %v103_v9, %v102_v8  ;;  %v105_v15 = vld [vmem:[#allocation3 + $0x18] sm:$0xff] }
  0x13   :  { %202 = vmatpush.bf16.msra.mxu0 %v617_v1  ;;  %628 = vmatpush.bf16.msra.mxu2 %v617_v1  ;;  %v142_v13 = vpack.c.bf16 %v119_v11, %v118_v10  ;;  %v120_v16 = vld [vmem:[#allocation3 + $0x90] sm:$0xff]  ;;  %v121_v17 = vld [vmem:[#allocation3 + $0x98] sm:$0xff]  ;;  %v135_v18 = vpack.c.bf16 %v105_v15, %v104_v14  ;;  %v106_v20 = vld [vmem:[#allocation3 + $0x20] sm:$0xff] }
  0x14   :  { %v143_v19 = vpack.c.bf16 %v121_v17, %v120_v16  ;;  %v107_v21 = vld [vmem:[#allocation3 + $0x28] sm:$0xff]  ;;  %v122_v22 = vld [vmem:[#allocation3 + $0xa0] sm:$0xff]  ;;  %v108_v26 = vld [vmem:[#allocation3 + $0x30] sm:$0xff] }
  0x15   :  { %v123_v23 = vld [vmem:[#allocation3 + $0xa8] sm:$0xff]  ;;  %v136_v24 = vpack.c.bf16 %v107_v21, %v106_v20  ;;  %v109_v27 = vld [vmem:[#allocation3 + $0x38] sm:$0xff]  ;;  %v124_v28 = vld [vmem:[#allocation3 + $0xb0] sm:$0xff] }
  0x16   :  { %v144_v25 = vpack.c.bf16 %v123_v23, %v122_v22  ;;  %v125_v29 = vld [vmem:[#allocation3 + $0xb8] sm:$0xff]  ;;  %v137_v30 = vpack.c.bf16 %v109_v27, %v108_v26  ;;  %v110_v32 = vld [vmem:[#allocation3 + $0x40] sm:$0xff]  ;;  %v111_v33 = vld [vmem:[#allocation3 + $0x48] sm:$0xff] }
  0x17   :  { %203 = vmatpush.bf16.msra.mxu0 %v616_v2  ;;  %629 = vmatpush.bf16.msra.mxu2 %v616_v2  ;;  %v145_v31 = vpack.c.bf16 %v125_v29, %v124_v28  ;;  %v126_v34 = vld [vmem:[#allocation3 + $0xc0] sm:$0xff]  ;;  %v127_v35 = vld [vmem:[#allocation3 + $0xc8] sm:$0xff]  ;;  %v138_v36 = vpack.c.bf16 %v111_v33, %v110_v32  ;;  %v626_v38 = vld [vmem:[#allocation7 + $0x38] sm:$0xff] }
  0x18   :  { %v146_v37 = vpack.c.bf16 %v127_v35, %v126_v34  ;;  %386 = vmatpush.bf16.msra.mxu1 %v626_v38  ;;  %635 = vmatpush.bf16.msra.mxu3 %v626_v38  ;;  %v112_v39 = vld [vmem:[#allocation3 + $0x50] sm:$0xff]  ;;  %v113_v40 = vld [vmem:[#allocation3 + $0x58] sm:$0xff]  ;;  %v624_v46 = vld [vmem:[#allocation7 + $0x28] sm:$0xff] }
  0x19   :  { %v128_v41 = vld [vmem:[#allocation3 + $0xd0] sm:$0xff]  ;;  %v129_v42 = vld [vmem:[#allocation3 + $0xd8] sm:$0xff]  ;;  %v139_v43 = vpack.c.bf16 %v113_v40, %v112_v39  ;;  %v623_v47 = vld [vmem:[#allocation7 + $0x20] sm:$0xff] }
  0x1a   :  { %v147_v44 = vpack.c.bf16 %v129_v42, %v128_v41  ;;  %v625_v45 = vld [vmem:[#allocation7 + $0x30] sm:$0xff]  ;;  %v114_v48 = vld [vmem:[#allocation3 + $0x60] sm:$0xff]  ;;  %v115_v49 = vld [vmem:[#allocation3 + $0x68] sm:$0xff] }
  0x1b   :  { %204 = vmatpush.bf16.msra.mxu0 %v615_v3  ;;  %630 = vmatpush.bf16.msra.mxu2 %v615_v3  ;;  %v130_v50 = vld [vmem:[#allocation3 + $0xe0] sm:$0xff]  ;;  %v131_v51 = vld [vmem:[#allocation3 + $0xe8] sm:$0xff]  ;;  %v622_v52 = vld [vmem:[#allocation7 + $0x18] sm:$0xff]  ;;  %v140_v53 = vpack.c.bf16 %v115_v49, %v114_v48 }
  0x1c   :  { %387 = vmatpush.bf16.msra.mxu1 %v625_v45  ;;  %636 = vmatpush.bf16.msra.mxu3 %v625_v45  ;;  %v148_v54 = vpack.c.bf16 %v131_v51, %v130_v50  ;;  %v621_v55 = vld [vmem:[#allocation7 + $0x10] sm:$0xff]  ;;  %v620_v56 = vld [vmem:[#allocation7 + $0x8] sm:$0xff]  ;;  %v619_v57 = vld [vmem:[#allocation7] sm:$0xff] }
  0x1d   :  { %v116_v58 = vld [vmem:[#allocation3 + $0x70] sm:$0xff]  ;;  %v117_v59 = vld [vmem:[#allocation3 + $0x78] sm:$0xff]  ;;  %v776_v1 = vld [vmem:[%s977_s2] ss:$0 sm:$0xff] }
  0x1e   :  { %v132_v60 = vld [vmem:[#allocation3 + $0xf0] sm:$0xff]  ;;  %v133_v61 = vld [vmem:[#allocation3 + $0xf8] sm:$0xff]  ;;  %v141_v62 = vpack.c.bf16 %v117_v59, %v116_v58 }
  0x1f   :  { %205 = vmatpush.bf16.msra.mxu0 %v614_v4  ;;  %631 = vmatpush.bf16.msra.mxu2 %v614_v4  ;;  %v149_v63 = vpack.c.bf16 %v133_v61, %v132_v60 }
  0x20   :  { %388 = vmatpush.bf16.msra.mxu1 %v624_v46  ;;  %637 = vmatpush.bf16.msra.mxu3 %v624_v46 }
  0x23   :  { %206 = vmatpush.bf16.msra.mxu0 %v613_v5  ;;  %632 = vmatpush.bf16.msra.mxu2 %v613_v5 }
  0x24   :  { %389 = vmatpush.bf16.msra.mxu1 %v623_v47  ;;  %638 = vmatpush.bf16.msra.mxu3 %v623_v47 }
  0x27   :  { %207 = vmatpush.bf16.msra.mxu0 %v612_v6  ;;  %633 = vmatpush.bf16.msra.mxu2 %v612_v6 }
  0x28   :  { %390 = vmatpush.bf16.msra.mxu1 %v622_v52  ;;  %639 = vmatpush.bf16.msra.mxu3 %v622_v52 }
  0x2b   :  { %208 = vmatpush.bf16.msra.mxu0 %v611_v7  ;;  %634 = vmatpush.bf16.msra.mxu2 %v611_v7 }
  0x2c   :  { %391 = vmatpush.bf16.msra.mxu1 %v621_v55  ;;  %640 = vmatpush.bf16.msra.mxu3 %v621_v55 }
  0x2e   :  { %209 = vmatmul.bf16.vlgmr.msra.gmra.mxu0 %v134_v12  ;;  %249 = vmatmul.bf16.vlgmr.msra.gmra.mxu2 %v142_v13 }
  0x30   :  { %392 = vmatpush.bf16.msra.mxu1 %v620_v56  ;;  %641 = vmatpush.bf16.msra.mxu3 %v620_v56 }
  0x34   :  { %393 = vmatpush.bf16.msra.mxu1 %v619_v57  ;;  %642 = vmatpush.bf16.msra.mxu3 %v619_v57 }
  0x3e   :  { %214 = vmatmul.bf16.gmra.mxu0 %v135_v18  ;;  %254 = vmatmul.bf16.gmra.mxu2 %v143_v19 }
  0x4e   :  { %219 = vmatmul.bf16.gmra.mxu0 %v136_v24  ;;  %259 = vmatmul.bf16.gmra.mxu2 %v144_v25 }
  0x5e   :  { %224 = vmatmul.bf16.gmra.mxu0 %v137_v30  ;;  %264 = vmatmul.bf16.gmra.mxu2 %v145_v31 }
  0x6e   :  { %229 = vmatmul.bf16.gmra.mxu0 %v138_v36  ;;  %269 = vmatmul.bf16.gmra.mxu2 %v146_v37 }
  0x7e   :  { %234 = vmatmul.bf16.gmra.mxu0 %v139_v43  ;;  %274 = vmatmul.bf16.gmra.mxu2 %v147_v44 }
  0x8e   :  { %239 = vmatmul.bf16.gmra.mxu0 %v140_v53  ;;  %279 = vmatmul.bf16.gmra.mxu2 %v148_v54 }
  0x9e   :  { %244 = vmatmul.bf16.gmra.mxu0 %v141_v62  ;;  %284 = vmatmul.bf16.gmra.mxu2 %v149_v63 }
  0xab   :  { %v210_v0 = vpop.f32.mrf.mxu0 }
  0xac   :  { %v211_v2 = vadd.f32 %v776_v1, %v210_v0 }
  0xae   :  { %v290_v5 = vmax.f32 %v211_v2, 0.0 }
  0xb1   :  { %v250_v3 = vpop.f32.mrf.mxu2 }
  0xb2   :  { %v251_v8 = vadd.f32 %v776_v1, %v250_v3 }
  0xb3   :  { %v212_v4 = vpop.f32.mrf.mxu0 }
  0xb4   :  { %v213_v6 = vadd.f32 %v776_v1, %v212_v4  ;;  %v306_v13 = vmax.f32 %v251_v8, 0.0 }
  0xb6   :  { %v291_v7 = vmax.f32 %v213_v6, 0.0 }
  0xb8   :  { %v322_v9 = vpack.c.bf16 %v291_v7, %v290_v5 }
  0xb9   :  { %v252_v10 = vpop.f32.mrf.mxu2 }
  0xba   :  { %v253_v11 = vadd.f32 %v776_v1, %v252_v10  ;;  %394 = vmatmul.bf16.vlgmr.msra.gmra.mxu1 %v322_v9 }
  0xbb   :  { %v215_v12 = vpop.f32.mrf.mxu0 }
  0xbc   :  { %v307_v14 = vmax.f32 %v253_v11, 0.0  ;;  %v216_v16 = vadd.f32 %v776_v1, %v215_v12 }
  0xbe   :  { %v330_v15 = vpack.c.bf16 %v307_v14, %v306_v13  ;;  %v292_v19 = vmax.f32 %v216_v16, 0.0 }
  0xc0   :  { %434 = vmatmul.bf16.vlgmr.msra.gmra.mxu3 %v330_v15 }
  0xc1   :  { %v255_v17 = vpop.f32.mrf.mxu2 }
  0xc2   :  { %v256_v22 = vadd.f32 %v776_v1, %v255_v17 }
  0xc3   :  { %v217_v18 = vpop.f32.mrf.mxu0 }
  0xc4   :  { %v218_v20 = vadd.f32 %v776_v1, %v217_v18  ;;  %v308_v27 = vmax.f32 %v256_v22, 0.0 }
  0xc6   :  { %v293_v21 = vmax.f32 %v218_v20, 0.0 }
  0xc8   :  { %v323_v23 = vpack.c.bf16 %v293_v21, %v292_v19 }
  0xc9   :  { %v257_v24 = vpop.f32.mrf.mxu2 }
  0xca   :  { %v258_v25 = vadd.f32 %v776_v1, %v257_v24  ;;  %399 = vmatmul.bf16.gmra.mxu1 %v323_v23 }
  0xcb   :  { %v220_v26 = vpop.f32.mrf.mxu0 }
  0xcc   :  { %v309_v28 = vmax.f32 %v258_v25, 0.0  ;;  %v221_v30 = vadd.f32 %v776_v1, %v220_v26 }
  0xce   :  { %v331_v29 = vpack.c.bf16 %v309_v28, %v308_v27  ;;  %v294_v33 = vmax.f32 %v221_v30, 0.0 }
  0xd0   :  { %439 = vmatmul.bf16.gmra.mxu3 %v331_v29 }
  0xd1   :  { %v260_v31 = vpop.f32.mrf.mxu2 }
  0xd2   :  { %v261_v36 = vadd.f32 %v776_v1, %v260_v31 }
  0xd3   :  { %v222_v32 = vpop.f32.mrf.mxu0 }
  0xd4   :  { %v223_v34 = vadd.f32 %v776_v1, %v222_v32  ;;  %v310_v41 = vmax.f32 %v261_v36, 0.0 }
  0xd6   :  { %v295_v35 = vmax.f32 %v223_v34, 0.0 }
  0xd8   :  { %v324_v37 = vpack.c.bf16 %v295_v35, %v294_v33 }
  0xd9   :  { %v262_v38 = vpop.f32.mrf.mxu2 }
  0xda   :  { %v263_v39 = vadd.f32 %v776_v1, %v262_v38  ;;  %404 = vmatmul.bf16.gmra.mxu1 %v324_v37 }
  0xdb   :  { %v225_v40 = vpop.f32.mrf.mxu0 }
  0xdc   :  { %v311_v42 = vmax.f32 %v263_v39, 0.0  ;;  %v226_v44 = vadd.f32 %v776_v1, %v225_v40 }
  0xde   :  { %v332_v43 = vpack.c.bf16 %v311_v42, %v310_v41  ;;  %v296_v47 = vmax.f32 %v226_v44, 0.0 }
  0xe0   :  { %444 = vmatmul.bf16.gmra.mxu3 %v332_v43 }
  0xe1   :  { %v265_v45 = vpop.f32.mrf.mxu2 }
  0xe2   :  { %v266_v50 = vadd.f32 %v776_v1, %v265_v45 }
  0xe3   :  { %v227_v46 = vpop.f32.mrf.mxu0 }
  0xe4   :  { %v228_v48 = vadd.f32 %v776_v1, %v227_v46  ;;  %v312_v55 = vmax.f32 %v266_v50, 0.0  ;;  %v813_v50 = vstv %s979_s4 }
  0xe6   :  { %v297_v49 = vmax.f32 %v228_v48, 0.0 }
  0xe8   :  { %v325_v51 = vpack.c.bf16 %v297_v49, %v296_v47 }
  0xe9   :  { %v267_v52 = vpop.f32.mrf.mxu2 }
  0xea   :  { %v268_v53 = vadd.f32 %v776_v1, %v267_v52  ;;  %409 = vmatmul.bf16.gmra.mxu1 %v325_v51 }
  0xeb   :  { %v230_v54 = vpop.f32.mrf.mxu0 }
  0xec   :  { %v313_v56 = vmax.f32 %v268_v53, 0.0  ;;  %v231_v58 = vadd.f32 %v776_v1, %v230_v54 }
  0xee   :  { %v333_v57 = vpack.c.bf16 %v313_v56, %v312_v55  ;;  %v298_v61 = vmax.f32 %v231_v58, 0.0 }
  0xf0   :  { %449 = vmatmul.bf16.gmra.mxu3 %v333_v57 }
  0xf1   :  { %v270_v59 = vpop.f32.mrf.mxu2 }
  0xf2   :  { %v271_v0 = vadd.f32 %v776_v1, %v270_v59 }
  0xf3   :  { %v232_v60 = vpop.f32.mrf.mxu0 }
  0xf4   :  { %v233_v62 = vadd.f32 %v776_v1, %v232_v60  ;;  %v314_v6 = vmax.f32 %v271_v0, 0.0 }
  0xf6   :  { %v299_v63 = vmax.f32 %v233_v62, 0.0 }
  0xf8   :  { %v326_v2 = vpack.c.bf16 %v299_v63, %v298_v61 }
  0xf9   :  { %v272_v3 = vpop.f32.mrf.mxu2 }
  0xfa   :  { %v273_v4 = vadd.f32 %v776_v1, %v272_v3  ;;  %414 = vmatmul.bf16.gmra.mxu1 %v326_v2 }
  0xfb   :  { %v235_v5 = vpop.f32.mrf.mxu0 }
  0xfc   :  { %v315_v7 = vmax.f32 %v273_v4, 0.0  ;;  %v236_v9 = vadd.f32 %v776_v1, %v235_v5 }
  0xfe   :  { %v334_v8 = vpack.c.bf16 %v315_v7, %v314_v6  ;;  %v300_v12 = vmax.f32 %v236_v9, 0.0 }
 0x100   :  { %454 = vmatmul.bf16.gmra.mxu3 %v334_v8 }
 0x101   :  { %v275_v10 = vpop.f32.mrf.mxu2 }
 0x102   :  { %v276_v15 = vadd.f32 %v776_v1, %v275_v10 }
 0x103   :  { %v237_v11 = vpop.f32.mrf.mxu0 }
 0x104   :  { %v238_v13 = vadd.f32 %v776_v1, %v237_v11  ;;  %v316_v20 = vmax.f32 %v276_v15, 0.0 }
 0x106   :  { %v301_v14 = vmax.f32 %v238_v13, 0.0 }
 0x108   :  { %v327_v16 = vpack.c.bf16 %v301_v14, %v300_v12 }
 0x109   :  { %v277_v17 = vpop.f32.mrf.mxu2 }
 0x10a   :  { %v278_v18 = vadd.f32 %v776_v1, %v277_v17  ;;  %419 = vmatmul.bf16.gmra.mxu1 %v327_v16 }
 0x10b   :  { %v240_v19 = vpop.f32.mrf.mxu0 }
 0x10c   :  { %v317_v21 = vmax.f32 %v278_v18, 0.0  ;;  %v241_v23 = vadd.f32 %v776_v1, %v240_v19 }
 0x10e   :  { %v335_v22 = vpack.c.bf16 %v317_v21, %v316_v20  ;;  %v302_v26 = vmax.f32 %v241_v23, 0.0 }
 0x110   :  { %459 = vmatmul.bf16.gmra.mxu3 %v335_v22 }
 0x111   :  { %v280_v24 = vpop.f32.mrf.mxu2 }
 0x112   :  { %v281_v29 = vadd.f32 %v776_v1, %v280_v24 }
 0x113   :  { %v242_v25 = vpop.f32.mrf.mxu0 }
 0x114   :  { %v243_v27 = vadd.f32 %v776_v1, %v242_v25  ;;  %v318_v34 = vmax.f32 %v281_v29, 0.0 }
 0x116   :  { %v303_v28 = vmax.f32 %v243_v27, 0.0 }
 0x118   :  { %v328_v30 = vpack.c.bf16 %v303_v28, %v302_v26 }
 0x119   :  { %v282_v31 = vpop.f32.mrf.mxu2 }
 0x11a   :  { %v283_v32 = vadd.f32 %v776_v1, %v282_v31  ;;  %424 = vmatmul.bf16.gmra.mxu1 %v328_v30 }
 0x11b   :  { %v245_v33 = vpop.f32.mrf.mxu0 }
 0x11c   :  { %v319_v35 = vmax.f32 %v283_v32, 0.0  ;;  %v246_v37 = vadd.f32 %v776_v1, %v245_v33 }
 0x11e   :  { %v336_v36 = vpack.c.bf16 %v319_v35, %v318_v34  ;;  %v304_v40 = vmax.f32 %v246_v37, 0.0 }
 0x120   :  { %464 = vmatmul.bf16.gmra.mxu3 %v336_v36 }
 0x121   :  { %v285_v38 = vpop.f32.mrf.mxu2 }
 0x122   :  { %v286_v43 = vadd.f32 %v776_v1, %v285_v38 }
 0x123   :  { %v247_v39 = vpop.f32.mrf.mxu0 }
 0x124   :  { %v248_v41 = vadd.f32 %v776_v1, %v247_v39  ;;  %v320_v47 = vmax.f32 %v286_v43, 0.0 }
 0x126   :  { %v305_v42 = vmax.f32 %v248_v41, 0.0 }
 0x128   :  { %v329_v44 = vpack.c.bf16 %v305_v42, %v304_v40 }
 0x129   :  { %v287_v45 = vpop.f32.mrf.mxu2 }
 0x12a   :  { %v288_v46 = vadd.f32 %v776_v1, %v287_v45  ;;  %429 = vmatmul.bf16.gmra.mxu1 %v329_v44 }
 0x12c   :  { %v321_v48 = vmax.f32 %v288_v46, 0.0 }
 0x12e   :  { %v337_v49 = vpack.c.bf16 %v321_v48, %v320_v47 }
 0x130   :  { %469 = vmatmul.bf16.gmra.mxu3 %v337_v49 }
 0x137   :  { %v395_v51 = vpop.f32.mrf.mxu1 }
 0x138   :  { %v476_v52 = vadd.f32 %v813_v50, %v395_v51 }
 0x13a   :  { %509 = vst.msk [vmem:[%s980_s5] sm:$0xff] %vm508_vm0, %v476_v52 }
 0x13f   :  { %v397_v1 = vpop.f32.mrf.mxu1 }
 0x140   :  { %v477_v53 = vadd.f32 %v813_v50, %v397_v1 }
 0x142   :  { %510 = vst.msk [vmem:[%s980_s5 + $0x8] sm:$0xff] %vm508_vm0, %v477_v53 }
 0x143   :  { %v435_v54 = vpop.f32.mrf.mxu3 }
 0x144   :  { %v492_v55 = vadd.f32 %v813_v50, %v435_v54 }
 0x146   :  { %525 = vst.msk [vmem:[%s980_s5 + $0x80] sm:$0xff] %vm508_vm0, %v492_v55 }
 0x147   :  { %v400_v56 = vpop.f32.mrf.mxu1 }
 0x148   :  { %v478_v57 = vadd.f32 %v813_v50, %v400_v56 }
 0x14a   :  { %511 = vst.msk [vmem:[%s980_s5 + $0x10] sm:$0xff] %vm508_vm0, %v478_v57 }
 0x14b   :  { %v437_v58 = vpop.f32.mrf.mxu3 }
 0x14c   :  { %v493_v59 = vadd.f32 %v813_v50, %v437_v58 }
 0x14e   :  { %526 = vst.msk [vmem:[%s980_s5 + $0x88] sm:$0xff] %vm508_vm0, %v493_v59 }
 0x14f   :  { %v402_v60 = vpop.f32.mrf.mxu1 }
 0x150   :  { %v479_v61 = vadd.f32 %v813_v50, %v402_v60 }
 0x152   :  { %512 = vst.msk [vmem:[%s980_s5 + $0x18] sm:$0xff] %vm508_vm0, %v479_v61 }
 0x153   :  { %v440_v62 = vpop.f32.mrf.mxu3 }
 0x154   :  { %v494_v63 = vadd.f32 %v813_v50, %v440_v62 }
 0x156   :  { %527 = vst.msk [vmem:[%s980_s5 + $0x90] sm:$0xff] %vm508_vm0, %v494_v63 }
 0x157   :  { %v405_v0 = vpop.f32.mrf.mxu1 }
 0x158   :  { %v480_v2 = vadd.f32 %v813_v50, %v405_v0 }
 0x15a   :  { %513 = vst.msk [vmem:[%s980_s5 + $0x20] sm:$0xff] %vm508_vm0, %v480_v2 }
 0x15b   :  { %v442_v3 = vpop.f32.mrf.mxu3 }
 0x15c   :  { %v495_v4 = vadd.f32 %v813_v50, %v442_v3 }
 0x15e   :  { %528 = vst.msk [vmem:[%s980_s5 + $0x98] sm:$0xff] %vm508_vm0, %v495_v4 }
 0x15f   :  { %v407_v5 = vpop.f32.mrf.mxu1 }
 0x160   :  { %v481_v6 = vadd.f32 %v813_v50, %v407_v5 }
 0x162   :  { %514 = vst.msk [vmem:[%s980_s5 + $0x28] sm:$0xff] %vm508_vm0, %v481_v6 }
 0x163   :  { %v445_v7 = vpop.f32.mrf.mxu3 }
 0x164   :  { %v496_v8 = vadd.f32 %v813_v50, %v445_v7 }
 0x166   :  { %529 = vst.msk [vmem:[%s980_s5 + $0xa0] sm:$0xff] %vm508_vm0, %v496_v8 }
 0x167   :  { %v410_v9 = vpop.f32.mrf.mxu1 }
 0x168   :  { %v482_v10 = vadd.f32 %v813_v50, %v410_v9 }
 0x16a   :  { %515 = vst.msk [vmem:[%s980_s5 + $0x30] sm:$0xff] %vm508_vm0, %v482_v10 }
 0x16b   :  { %v447_v11 = vpop.f32.mrf.mxu3 }
 0x16c   :  { %v497_v12 = vadd.f32 %v813_v50, %v447_v11 }
 0x16e   :  { %530 = vst.msk [vmem:[%s980_s5 + $0xa8] sm:$0xff] %vm508_vm0, %v497_v12 }
 0x16f   :  { %v412_v13 = vpop.f32.mrf.mxu1 }
 0x170   :  { %v483_v14 = vadd.f32 %v813_v50, %v412_v13 }
 0x172   :  { %516 = vst.msk [vmem:[%s980_s5 + $0x38] sm:$0xff] %vm508_vm0, %v483_v14 }
 0x173   :  { %v450_v15 = vpop.f32.mrf.mxu3 }
 0x174   :  { %v498_v16 = vadd.f32 %v813_v50, %v450_v15 }
 0x176   :  { %531 = vst.msk [vmem:[%s980_s5 + $0xb0] sm:$0xff] %vm508_vm0, %v498_v16 }
 0x177   :  { %v415_v17 = vpop.f32.mrf.mxu1 }
 0x178   :  { %v484_v18 = vadd.f32 %v813_v50, %v415_v17 }
 0x17a   :  { %517 = vst.msk [vmem:[%s980_s5 + $0x40] sm:$0xff] %vm508_vm0, %v484_v18 }
 0x17b   :  { %v452_v19 = vpop.f32.mrf.mxu3 }
 0x17c   :  { %v499_v20 = vadd.f32 %v813_v50, %v452_v19 }
 0x17e   :  { %532 = vst.msk [vmem:[%s980_s5 + $0xb8] sm:$0xff] %vm508_vm0, %v499_v20 }
 0x17f   :  { %v417_v21 = vpop.f32.mrf.mxu1 }
 0x180   :  { %v485_v22 = vadd.f32 %v813_v50, %v417_v21 }
 0x182   :  { %518 = vst.msk [vmem:[%s980_s5 + $0x48] sm:$0xff] %vm508_vm0, %v485_v22 }
 0x183   :  { %v455_v23 = vpop.f32.mrf.mxu3 }
 0x184   :  { %v500_v24 = vadd.f32 %v813_v50, %v455_v23 }
 0x186   :  { %533 = vst.msk [vmem:[%s980_s5 + $0xc0] sm:$0xff] %vm508_vm0, %v500_v24 }
 0x187   :  { %v420_v25 = vpop.f32.mrf.mxu1 }
 0x188   :  { %v486_v26 = vadd.f32 %v813_v50, %v420_v25 }
 0x18a   :  { %519 = vst.msk [vmem:[%s980_s5 + $0x50] sm:$0xff] %vm508_vm0, %v486_v26 }
 0x18b   :  { %v457_v27 = vpop.f32.mrf.mxu3 }
 0x18c   :  { %v501_v28 = vadd.f32 %v813_v50, %v457_v27 }
 0x18e   :  { %534 = vst.msk [vmem:[%s980_s5 + $0xc8] sm:$0xff] %vm508_vm0, %v501_v28 }
 0x18f   :  { %v422_v29 = vpop.f32.mrf.mxu1 }
 0x190   :  { %v487_v30 = vadd.f32 %v813_v50, %v422_v29 }
 0x192   :  { %520 = vst.msk [vmem:[%s980_s5 + $0x58] sm:$0xff] %vm508_vm0, %v487_v30 }
 0x193   :  { %v460_v31 = vpop.f32.mrf.mxu3 }
 0x194   :  { %v502_v32 = vadd.f32 %v813_v50, %v460_v31 }
 0x196   :  { %535 = vst.msk [vmem:[%s980_s5 + $0xd0] sm:$0xff] %vm508_vm0, %v502_v32 }
 0x197   :  { %v425_v33 = vpop.f32.mrf.mxu1 }
 0x198   :  { %v488_v34 = vadd.f32 %v813_v50, %v425_v33 }
 0x19a   :  { %521 = vst.msk [vmem:[%s980_s5 + $0x60] sm:$0xff] %vm508_vm0, %v488_v34 }
 0x19b   :  { %v462_v35 = vpop.f32.mrf.mxu3 }
 0x19c   :  { %v503_v36 = vadd.f32 %v813_v50, %v462_v35 }
 0x19e   :  { %536 = vst.msk [vmem:[%s980_s5 + $0xd8] sm:$0xff] %vm508_vm0, %v503_v36 }
 0x19f   :  { %v427_v37 = vpop.f32.mrf.mxu1 }
 0x1a0   :  { %v489_v38 = vadd.f32 %v813_v50, %v427_v37 }
 0x1a2   :  { %522 = vst.msk [vmem:[%s980_s5 + $0x68] sm:$0xff] %vm508_vm0, %v489_v38 }
 0x1a3   :  { %v465_v39 = vpop.f32.mrf.mxu3 }
 0x1a4   :  { %v504_v40 = vadd.f32 %v813_v50, %v465_v39 }
 0x1a6   :  { %537 = vst.msk [vmem:[%s980_s5 + $0xe0] sm:$0xff] %vm508_vm0, %v504_v40 }
 0x1a7   :  { %v430_v41 = vpop.f32.mrf.mxu1 }
 0x1a8   :  { %v490_v42 = vadd.f32 %v813_v50, %v430_v41 }
 0x1aa   :  { %523 = vst.msk [vmem:[%s980_s5 + $0x70] sm:$0xff] %vm508_vm0, %v490_v42 }
 0x1ab   :  { %v467_v43 = vpop.f32.mrf.mxu3 }
 0x1ac   :  { %v505_v44 = vadd.f32 %v813_v50, %v467_v43 }
 0x1ae   :  { %538 = vst.msk [vmem:[%s980_s5 + $0xe8] sm:$0xff] %vm508_vm0, %v505_v44 }
 0x1af   :  { %v432_v45 = vpop.f32.mrf.mxu1 }
 0x1b0   :  { %v491_v46 = vadd.f32 %v813_v50, %v432_v45 }
 0x1b2   :  { %524 = vst.msk [vmem:[%s980_s5 + $0x78] sm:$0xff] %vm508_vm0, %v491_v46 }
 0x1b3   :  { %v470_v47 = vpop.f32.mrf.mxu3 }
 0x1b4   :  { %v506_v48 = vadd.f32 %v813_v50, %v470_v47 }
 0x1b6   :  { %539 = vst.msk [vmem:[%s980_s5 + $0xf0] sm:$0xff] %vm508_vm0, %v506_v48 }
 0x1bb   :  { %v472_v49 = vpop.f32.mrf.mxu3 }
 0x1bc   :  { %v507_v51 = vadd.f32 %v813_v50, %v472_v49 }
 0x1be   :  { %540 = vst.msk [vmem:[%s980_s5 + $0xf8] sm:$0xff] %vm508_vm0, %v507_v51 }
 0x1bf   :  { %545 = vsyncpa [#allocation4], 1 }
 0x1c0   :  { %546 = vsyncpa [#allocation6], 1 }

</bundles_post_ra>
